<compile_context>
chip_gen: v7x
topology: tpu7x:2x2x1
jax: 0.10.0
libtpu: 0.0.40
codegen_flags: <defaults>
</compile_context>

<pallas_src>
import functools

import jax
import jax.numpy as jnp
from jax.experimental import pallas as pl
from jax.experimental.pallas import tpu as pltpu


def _round_up(v, m):
    return ((v + m - 1) // m) * m


def _gated_attn_kernel(x_ref, wab_ref, bab_ref, wc_ref, bc_ref, o_ref, *, h_pad):
    # x tile straight into the MXU (native dtype; caller may pre-cast the
    # fused weights to bf16, in which case x is cast to match); f32 accum.
    x = x_ref[...]
    w = wab_ref[...]
    if x.dtype != w.dtype:
        x = x.astype(w.dtype)
    z = jnp.dot(x, w, preferred_element_type=jnp.float32) + bab_ref[...]

    # Lane-aligned split (h_pad is a multiple of 128, so no mid-vreg slice).
    a = jnp.tanh(z[:, :h_pad])                       # attention_a branch
    b = 0.5 * (jnp.tanh(0.5 * z[:, h_pad:]) + 1.0)   # sigmoid via tanh (1 EUP op)
    gated = a * b                                    # [tile_n, h_pad]

    # Final [H] -> 1 projection: VPU broadcast-multiply + lane reduction
    # (wc is a [1, h_pad] row); bc comes from SMEM as a scalar.
    attn = jnp.sum(gated * wc_ref[...], axis=-1, keepdims=True) + bc_ref[0, 0]
    o_ref[...] = attn.astype(o_ref.dtype)


def prepare_params(wa, ba, wb, bb, wc, bc, *, matmul_dtype=None):
    """Fuse + lane-align the parameters once (cache/reuse across calls).

    wa, wb: [D, H]; ba, bb: [1, H] (or [H]); wc: [H, 1] (or [H]); bc: [1, 1].
    Each branch is zero-padded to h_pad = round_up(H, 128) lanes so the
    branch split inside the kernel is vreg-aligned; the zero columns produce
    tanh(0)=0 in the `a` branch, so they contribute nothing to the output.
    """
    d, h = wa.shape
    h_pad = _round_up(h, 128)
    f32 = jnp.float32

    def pad_w(w):  # [D, H] -> [D, h_pad]
        return jnp.pad(w.astype(f32), ((0, 0), (0, h_pad - h)))

    def pad_row(v):  # [..., H] -> [1, h_pad]
        return jnp.pad(v.reshape(1, h).astype(f32), ((0, 0), (0, h_pad - h)))

    w_ab = jnp.concatenate([pad_w(wa), pad_w(wb)], axis=1)   # [D, 2*h_pad]
    b_ab = jnp.concatenate([pad_row(ba), pad_row(bb)], axis=1)  # [1, 2*h_pad]
    wc_row = pad_row(wc)                                      # [1, h_pad]
    bc_s = bc.reshape(1, 1).astype(f32)                       # SMEM scalar

    if matmul_dtype is not None:
        w_ab = w_ab.astype(matmul_dtype)                      # bf16 MXU operands

    return {"w_ab": w_ab, "b_ab": b_ab, "wc": wc_row, "bc": bc_s,
            "h_pad": h_pad, "d": d}


def attn_net_gated_prepared(x, params, *, tile_n=1024, vmem_frac=0.7):
    """x: [N, D] -> attention scores [N, 1]."""
    n, d = x.shape
    w_ab, b_ab, wc_row, bc_s = params["w_ab"], params["b_ab"], params["wc"], params["bc"]
    h_pad = params["h_pad"]
    assert params["d"] == d, "input_dim mismatch between x and parameters"

    # --- VMEM budget derived from the actual chip (v7x: 64 MiB per TC;
    #     v5e/v6e: 128 MiB), leaving headroom for compiler scratch. ---
    try:
        vmem_cap = int(pltpu.get_tpu_info().vmem_capacity_bytes)
    except Exception:
        vmem_cap = 64 * 1024 * 1024          # conservative default (v7x per-TC)
    vmem_budget = max(int(vmem_cap * vmem_frac), 32 * 1024 * 1024)

    x_bytes = jnp.dtype(x.dtype).itemsize
    w_bytes = jnp.dtype(w_ab.dtype).itemsize
    # Rough per-step footprint: double-buffered x tile + resident weights
    # (double-buffered by the default pipeline) + f32 temporaries (z/a/b/gated)
    # + the lane-padded (tile_n, 1)->(tile_n, 128) output block.
    fixed = 2 * w_bytes * d * 2 * h_pad + 2 * 4 * 3 * h_pad + (64 << 10)
    per_row = 2 * d * x_bytes + 3 * (2 * h_pad) * 4 + 2 * 128 * 4
    tile_cap = max(8, ((vmem_budget - fixed) // per_row) // 8 * 8)

    # Tile over N: multiple of 8 sublanes, no larger than the problem or the
    # VMEM budget; keep >= 2 grid steps when there's enough work so v7x's two
    # TensorCores both get a share under ("parallel",).
    tile_n = _round_up(max(8, min(tile_n, n)), 8)
    tile_n = min(tile_n, tile_cap)
    if n > 16:
        tile_n = min(tile_n, _round_up(pl.cdiv(n, 2), 8))
    tile_n = max(tile_n, 8)
    num_tiles = pl.cdiv(n, tile_n)   # ragged last tile handled by Pallas masking

    out = pl.pallas_call(
        functools.partial(_gated_attn_kernel, h_pad=h_pad),
        out_shape=jax.ShapeDtypeStruct((n, 1), x.dtype),
        grid=(num_tiles,),
        in_specs=[
            # x: tiled along N, auto-pipelined (DMA of tile i+1 overlaps compute).
            pl.BlockSpec((tile_n, d), lambda i: (i, 0)),
            # Fused weights / biases: constant index_map -> DMA'd once, VMEM-resident.
            pl.BlockSpec((d, 2 * h_pad), lambda i: (0, 0)),
            pl.BlockSpec((1, 2 * h_pad), lambda i: (0, 0)),
            pl.BlockSpec((1, h_pad), lambda i: (0, 0)),
            # bc: single scalar in SMEM (no padded VMEM tile / DMA descriptor).
            pl.BlockSpec(memory_space=pltpu.MemorySpace.SMEM),
        ],
        out_specs=pl.BlockSpec((tile_n, 1), lambda i: (i, 0)),
        compiler_params=pltpu.CompilerParams(
            dimension_semantics=("parallel",),   # megacore sharding on v7x
            vmem_limit_bytes=int(vmem_budget),
        ),
    )(x, w_ab, b_ab, wc_row, bc_s)

    return out


def attn_net_gated(x, wa, ba, wb, bb, wc, bc, *, tile_n=1024, matmul_dtype=None):
    """Convenience wrapper: fuse params then run the kernel.

    For repeated calls with the same parameters, call prepare_params() once
    and reuse the result with attn_net_gated_prepared().
    """
    params = prepare_params(wa, ba, wb, bb, wc, bc, matmul_dtype=matmul_dtype)
    return attn_net_gated_prepared(x, params, tile_n=tile_n)


def _reference(x, wa, ba, wb, bb, wc, bc):
    a = jnp.tanh(x @ wa + ba)
    b = jax.nn.sigmoid(x @ wb + bb)
    return (a * b) @ wc + bc


if __name__ == "__main__":
    # Small, shape-consistent synthetic problem:
    #   N = 8 instances, input_dim = 32, hidden_dim = 32, output dim = 1
    N, D, H = 8, 32, 32

    key = jax.random.PRNGKey(0)
    kx, kwa, kba, kwb, kbb, kwc, kbc = jax.random.split(key, 7)

    x = jax.random.normal(kx, (N, D), dtype=jnp.float32)
    # Deterministic parameter init (synthetic; roughly Linear-style scaling).
    wa = jax.random.normal(kwa, (D, H), dtype=jnp.float32) * (1.0 / jnp.sqrt(D))
    ba = jax.random.normal(kba, (1, H), dtype=jnp.float32) * 0.01
    wb = jax.random.normal(kwb, (D, H), dtype=jnp.float32) * (1.0 / jnp.sqrt(D))
    bb = jax.random.normal(kbb, (1, H), dtype=jnp.float32) * 0.01
    wc = jax.random.normal(kwc, (H, 1), dtype=jnp.float32) * (1.0 / jnp.sqrt(H))
    bc = jax.random.normal(kbc, (1, 1), dtype=jnp.float32) * 0.01

    out = attn_net_gated(x, wa, ba, wb, bb, wc, bc)
    out = jax.block_until_ready(out)

    ref = _reference(x, wa, ba, wb, bb, wc, bc)
    assert out.shape == (N, 1)
    assert jnp.allclose(out, ref, atol=1e-5, rtol=1e-5)

    print("KERNEL_OK")
</pallas_src>

<mosaic_0001>
module attributes {stable_mosaic.version = 11 : i64} {
  func.func @_gated_attn_kernel(%arg0: i32, %arg1: memref<8x32xf32, #tpu.memory_space<vmem>>, %arg2: memref<32x256xf32, #tpu.memory_space<vmem>>, %arg3: memref<1x256xf32, #tpu.memory_space<vmem>>, %arg4: memref<1x128xf32, #tpu.memory_space<vmem>>, %arg5: memref<1x1xf32, #tpu.memory_space<smem>>, %arg6: memref<8x1xf32, #tpu.memory_space<vmem>>) attributes {dimension_semantics = [#tpu.dimension_semantics<parallel>], iteration_bounds = array<i64: 1>, scalar_prefetch = 0 : i64, scratch_operands = 0 : i64, tpu.core_type = #tpu.core_type<tc>, window_params = [{transform_indices = @transform_0, window_bounds = array<i64: 8, 32>}, {pipeline_mode = #tpu.pipeline_mode<synchronous>, transform_indices = @transform_1, window_bounds = array<i64: 32, 256>}, {pipeline_mode = #tpu.pipeline_mode<synchronous>, transform_indices = @transform_2, window_bounds = array<i64: 1, 256>}, {pipeline_mode = #tpu.pipeline_mode<synchronous>, transform_indices = @transform_3, window_bounds = array<i64: 1, 128>}, {transform_indices = @transform_4, window_bounds = array<i64: 1, 1>}, {transform_indices = @transform_5, window_bounds = array<i64: 8, 1>}]} {
    %c0 = arith.constant 0 : index
    %c0_0 = arith.constant 0 : index
    %0 = vector.load %arg1[%c0, %c0_0] : memref<8x32xf32, #tpu.memory_space<vmem>>, vector<8x32xf32>
    %c0_1 = arith.constant 0 : index
    %c0_2 = arith.constant 0 : index
    %1 = vector.load %arg2[%c0_1, %c0_2] : memref<32x256xf32, #tpu.memory_space<vmem>>, vector<32x256xf32>
    %cst = arith.constant dense<0.000000e+00> : vector<8x256xf32>
    %2 = tpu.matmul %0, %1, %cst {dimension_numbers = #tpu.dot_dimension_numbers<[1], [0], [0], [1], [0, 0, 1, 1], [], []>} : vector<8x32xf32>, vector<32x256xf32>, vector<8x256xf32> -> vector<8x256xf32>
    %c0_3 = arith.constant 0 : index
    %c0_4 = arith.constant 0 : index
    %3 = vector.load %arg3[%c0_3, %c0_4] : memref<1x256xf32, #tpu.memory_space<vmem>>, vector<1x256xf32>
    %4 = vector.broadcast %3 : vector<1x256xf32> to vector<8x256xf32>
    %5 = arith.addf %2, %4 : vector<8x256xf32>
    %6 = vector.extract_strided_slice %5 {offsets = [0, 0], sizes = [8, 128], strides = [1, 1]} : vector<8x256xf32> to vector<8x128xf32>
    %7 = math.tanh %6 : vector<8x128xf32>
    %8 = vector.extract_strided_slice %5 {offsets = [0, 128], sizes = [8, 128], strides = [1, 1]} : vector<8x256xf32> to vector<8x128xf32>
    %cst_5 = arith.constant 5.000000e-01 : f32
    %9 = vector.broadcast %cst_5 : f32 to vector<8x128xf32>
    %10 = arith.mulf %9, %8 : vector<8x128xf32>
    %11 = math.tanh %10 : vector<8x128xf32>
    %cst_6 = arith.constant 1.000000e+00 : f32
    %12 = vector.broadcast %cst_6 : f32 to vector<8x128xf32>
    %13 = arith.addf %11, %12 : vector<8x128xf32>
    %cst_7 = arith.constant 5.000000e-01 : f32
    %14 = vector.broadcast %cst_7 : f32 to vector<8x128xf32>
    %15 = arith.mulf %14, %13 : vector<8x128xf32>
    %16 = arith.mulf %7, %15 : vector<8x128xf32>
    %c0_8 = arith.constant 0 : index
    %c0_9 = arith.constant 0 : index
    %17 = vector.load %arg4[%c0_8, %c0_9] : memref<1x128xf32, #tpu.memory_space<vmem>>, vector<1x128xf32>
    %18 = vector.broadcast %17 : vector<1x128xf32> to vector<8x128xf32>
    %19 = arith.mulf %16, %18 : vector<8x128xf32>
    %cst_10 = arith.constant dense<0.000000e+00> : vector<8xf32>
    %20 = vector.multi_reduction <add>, %19, %cst_10 [1] : vector<8x128xf32> to vector<8xf32>
    %21 = vector.shape_cast %20 : vector<8xf32> to vector<8x1xf32>
    %c0_11 = arith.constant 0 : index
    %c0_12 = arith.constant 0 : index
    %22 = memref.load %arg5[%c0_11, %c0_12] : memref<1x1xf32, #tpu.memory_space<smem>>
    %23 = vector.broadcast %22 : f32 to vector<8x1xf32>
    %24 = arith.addf %21, %23 : vector<8x1xf32>
    %c0_13 = arith.constant 0 : index
    %c0_14 = arith.constant 0 : index
    %25 = vector.load %arg6[%c0_13, %c0_14] : memref<8x1xf32, #tpu.memory_space<vmem>>, vector<8x1xf32>
    tpu.vector_store %arg6[%c0_13, %c0_14], %24 {strides = array<i32>} : memref<8x1xf32, #tpu.memory_space<vmem>>, vector<8x1xf32>,
    return
  }
  func.func @transform_0(%arg0: i32) -> (i32, i32) {
    %c0_i32 = arith.constant 0 : i32
    %c0_i32_0 = arith.constant 0 : i32
    return %arg0, %c0_i32 : i32, i32
  }
  func.func @transform_1(%arg0: i32) -> (i32, i32) {
    %c0_i32 = arith.constant 0 : i32
    %c0_i32_0 = arith.constant 0 : i32
    %c0_i32_1 = arith.constant 0 : i32
    return %c0_i32, %c0_i32_0 : i32, i32
  }
  func.func @transform_2(%arg0: i32) -> (i32, i32) {
    %c0_i32 = arith.constant 0 : i32
    %c0_i32_0 = arith.constant 0 : i32
    %c0_i32_1 = arith.constant 0 : i32
    return %c0_i32, %c0_i32_0 : i32, i32
  }
  func.func @transform_3(%arg0: i32) -> (i32, i32) {
    %c0_i32 = arith.constant 0 : i32
    %c0_i32_0 = arith.constant 0 : i32
    %c0_i32_1 = arith.constant 0 : i32
    return %c0_i32, %c0_i32_0 : i32, i32
  }
  func.func @transform_4(%arg0: i32) -> (i32, i32) {
    %c0_i32 = arith.constant 0 : i32
    %c0_i32_0 = arith.constant 0 : i32
    %c0_i32_1 = arith.constant 0 : i32
    return %c0_i32, %c0_i32_0 : i32, i32
  }
  func.func @transform_5(%arg0: i32) -> (i32, i32) {
    %c0_i32 = arith.constant 0 : i32
    %c0_i32_0 = arith.constant 0 : i32
    return %arg0, %c0_i32 : i32, i32
  }
}

</mosaic_0001>

<bundles_post_ra>
// kernel: tpu_custom_call.1
= control target key start
LH: loop header
LB: loop body
LE: loop exit
PB: predicated region body
PF: predicated region fallthrough
CT: control target
= control target key end

     0   :  { %11 = vsyncpa [#allocation4], 0  ;;  %s315_s0 = inlined_call_operand.hbm [shape: f32[8,32], index: 0, kind: input, shape index: {}]   ;;  %s316_s1 = inlined_call_operand.hbm [shape: f32[32,256], index: 1, kind: input, shape index: {}]   ;;  %s317_s2 = inlined_call_operand.vmem [shape: f32[1,256], index: 2, kind: input, shape index: {}]   ;;  %s318_s3 = inlined_call_operand.vmem [shape: f32[1,128], index: 3, kind: input, shape index: {}]   ;;  %s319_s4 = inlined_call_operand.<no memory space> [shape: f32[1,1], index: 4, kind: input, shape index: {}]   ;;  %s320_s5 = inlined_call_operand.vmem [shape: f32[8,1], index: 5, kind: output, shape index: {}]  }
   0x1   :  { %12 = vsyncpa [#allocation6], 0  ;;  %s237_s18 = smov [#allocation3]   ;;  %s238_s20 = smov [#allocation5]  }
   0x2   :  { %s19_s19 = sshll.u32 %s237_s18, 4  ;;  %s28_s21 = sshll.u32 %s238_s20, 4  ;;  %s20_s19 = int_to_ptr.vmem [resolvable:$true] %s19_s19  ;;  %s272_s21 = int_to_ptr.vmem [resolvable:$true] %s28_s21 }
   0x3   :  { %s189_s24 = scalar_lea.hbm %s315_s0, 128 }
   0x4   :  { %p190_p0 = scmp.ne.s32.totalorder %s315_s0, %s189_s24  ;;  %p193_p1 = scmp.lt.u32.totalorder %s189_s24, %s315_s0 }
   0x6   :  { %p195_p2 = pnand %p193_p1, %p190_p0 }
   0x8   :  { %198 = shalt.err (!%p195_p2)
}
   0x9   :  { %s199_s29 = scalar_lea.vmem %s20_s19, 128  ;;  %p204_p4 = scmp.lt.s32.totalorder %s20_s19, %s20_s19 }
   0xa   :  { %p200_p3 = scmp.ne.s32.totalorder %s20_s19, %s199_s29  ;;  %p205_p5 = scmp.lt.s32.totalorder %s199_s29, %s199_s29 }
   0xc   :  { %p206_p6 = por %p205_p5, %p204_p4 }
   0xe   :  { %p207_p7 = pnand %p206_p6, %p200_p3 }
  0x10   :  { %210 = shalt.err (!%p207_p7)
}
  0x11   :  { %22 = dma.hbm_to_vmem [thread:$0]  %s315_s0, 128, %s20_s19, [#allocation4]  }
  0x12   :  { %s211_s9 = scalar_lea.hbm %s316_s1, 1024 }
  0x13   :  { %p212_p8 = scmp.ne.s32.totalorder %s316_s1, %s211_s9  ;;  %p215_p9 = scmp.lt.u32.totalorder %s211_s9, %s316_s1 }
  0x15   :  { %p217_p10 = pnand %p215_p9, %p212_p8 }
  0x17   :  { %220 = shalt.err (!%p217_p10)
}
  0x18   :  { %s221_s14 = scalar_lea.vmem %s272_s21, 1024  ;;  %p226_p12 = scmp.lt.s32.totalorder %s272_s21, %s272_s21 }
  0x19   :  { %p222_p11 = scmp.ne.s32.totalorder %s272_s21, %s221_s14  ;;  %p227_p13 = scmp.lt.s32.totalorder %s221_s14, %s221_s14 }
  0x1b   :  { %p228_p0 = por %p227_p13, %p226_p12 }
  0x1d   :  { %p229_p1 = pnand %p228_p0, %p222_p11 }
  0x1f   :  { %232 = shalt.err (!%p229_p1)
}
  0x20   :  { %s239_s0 = smov 256   ;;  %s240_s15 = smov 16  }
  0x21   :  { %34 = dma.hbm_to_vmem [thread:$0]  %s316_s1, 1024, %s272_s21, [#allocation6], %s239_s0, %s239_s0, %s240_s15  }
  0x22   :  { %233 = dma.done.wait [#allocation4], 128  }
  0x23   :  { %234 = vsyncadd [#allocation4], 4294967168 }
  0x24   :  { %235 = dma.done.wait [#allocation6], 1024  }
  0x25   :  { %236 = vsyncadd [#allocation6], 4294966272  ;;  %v241_v0 = vmov 0.0   ;;  %v49_v1 = vld [vmem:[#allocation5 + $0x8] sm:$0xff]  ;;  %v51_v2 = vld [vmem:[#allocation5 + $0x18] sm:$0xff]  ;;  %vm68_vm0 = vcmask 261120   ;;  %v58_v14 = vlaneseq  ;;  %v160_v33 = vstv %s319_s4 }
  0x26   :  { %136 = vmatprep.mubr.f32.mxu0 %v241_v0  ;;  %v48_v3 = vld [vmem:[#allocation5] sm:$0xff]  ;;  %v172_v4 = vpack.c.bf16 %v51_v2, %v49_v1  ;;  %v50_v5 = vld [vmem:[#allocation5 + $0x10] sm:$0xff]  ;;  %v53_v6 = vld [vmem:[#allocation5 + $0x28] sm:$0xff]  ;;  %vm162_vm1 = vcmask 7168  }
  0x27   :  { %v55_v7 = vld [vmem:[#allocation5 + $0x38] sm:$0xff]  ;;  %v174_v8 = vpack.c.bf16 %v50_v5, %v48_v3  ;;  %v52_v10 = vld [vmem:[#allocation5 + $0x20] sm:$0xff]  ;;  %v54_v11 = vld [vmem:[#allocation5 + $0x30] sm:$0xff]  ;;  %v59_v15 = vshrl.u32 %v58_v14, 7 }
  0x28   :  { %v176_v9 = vpack.c.bf16 %v55_v7, %v53_v6  ;;  %173 = vmatprep.subr.bf16.mxu0 %v172_v4  ;;  %v178_v12 = vpack.c.bf16 %v54_v11, %v52_v10  ;;  %v47_v13 = vld [vmem:[#allocation3] sm:$0xff] }
  0x29   :  { %175 = vmatpush1.bf16.msra.mxu0 %v174_v8  ;;  %v64_v16 = vsub.s32 1, %v59_v15  ;;  %v56_v17 = vld [vmem:[%s317_s2] sm:$0x3]  ;;  %v60_v18 = vsub.s32 0, %v59_v15 }
  0x2a   :  { %177 = vmatprep.subr.bf16.mxu0 %v176_v9  ;;  %v171_v30 = vld [vmem:[%s318_s3] ss:$0 sm:$0xff] }
  0x2b   :  { %v65_v19 = vrot.slane %v56_v17, %v64_v16  ;;  %v61_v22 = vrot.slane %v56_v17, %v60_v18 }
  0x2d   :  { %179 = vmatpush1.bf16.msra.mxu0 %v178_v12 }
  0x30   :  { %170 = vmatmul.mubr.msk.f32.vlgmr.msra.gmra.mrb[0].mxu0 %vm68_vm0, %v47_v13 }
 0x103   :  { %v138_v20 = vpop.f32.mrb[0].mxu0 }
 0x104   :  { %v140_v21 = vpop.f32.mrb[1].mxu0  ;;  %v139_v25 = vadd.f32 %v138_v20, %v61_v22 }
 0x105   :  { %v141_v23 = vadd.f32 %v140_v21, %v65_v19 }
 0x107   :  { %v144_v24 = vmul.f32 0.5, %v141_v23 }
 0x109   :  { %185 = vtanh.f32 %v144_v24 }
 0x10a   :  { %187 = vtanh.f32 %v139_v25 }
 0x113   :  { %v186_v26 = vpop.eup %185 }
 0x114   :  { %v146_v27 = vadd.f32 1.0, %v186_v26  ;;  %v188_v29 = vpop.eup %187 }
 0x116   :  { %v147_v28 = vmul.f32 0.5, %v146_v27 }
 0x118   :  { %v148_v31 = vmul.f32 %v188_v29, %v147_v28 }
 0x11a   :  { %v156_v32 = vmul.f32 %v171_v30, %v148_v31 }
 0x11c   :  { %157 = vadd.xlane.f32.xlu0 %v156_v32 }
 0x1a9   :  { %v158_v34 = vpop.xlane.xlu0 %157 }
 0x1aa   :  { %v161_v35 = vadd.f32 %v160_v33, %v158_v34 }
 0x1ac   :  { %163 = vst.msk [vmem:[%s320_s5] sm:$0xff] %vm162_vm1, %v161_v35 }
 0x1ad   :  { %168 = vsyncpa [#allocation4], 1 }
 0x1ae   :  { %169 = vsyncpa [#allocation6], 1 }

</bundles_post_ra>
